<compile_context>
chip_gen: v7x
topology: tpu7x:2x2x1
jax: 0.10.0
libtpu: 0.0.40
codegen_flags: <defaults>
</compile_context>

<pallas_src>
import jax
import jax.numpy as jnp
from jax.experimental import pallas as pl
from jax.experimental.pallas import tpu as pltpu

_LANES = 128
_MAX_BLOCK_ROWS = 16384  # hard cap on the row tile (16384 x 128 f32 = 8 MiB)


# ---------------------------------------------------------------------------
# Kernels
# ---------------------------------------------------------------------------
def _rbf_kernel_default_centers(gamma_ref, x_ref, o_ref):
    # gamma lives in SMEM; x / o are VMEM tiles.  Centers default to 1.0, so
    # no centers stream is DMA'd at all.  Up-cast in-register, compute in f32
    # (v5e has no bf16 VPU/EUP), cast back on the store.
    gamma = gamma_ref[0]
    diff = x_ref[...].astype(jnp.float32) - 1.0
    o_ref[...] = jnp.exp(-gamma * (diff * diff)).astype(o_ref.dtype)


def _rbf_kernel_with_centers(gamma_ref, x_ref, c_ref, o_ref):
    gamma = gamma_ref[0]
    diff = x_ref[...].astype(jnp.float32) - c_ref[...].astype(jnp.float32)
    o_ref[...] = jnp.exp(-gamma * (diff * diff)).astype(o_ref.dtype)


# ---------------------------------------------------------------------------
# Tiling / VMEM budgeting
# ---------------------------------------------------------------------------
def _pick_block_rows(bytes_per_elem_all_streams):
    """Generation-adaptive row-tile size + explicit scoped-VMEM limit.

    Total pipelined footprint = 2 buffers * (sum of stream itemsizes)
    * block_rows * 128.  Budget: half of physical VMEM, capped at 48 MiB
    (v7x: 64 MiB physical -> 32 MiB budget; v5e/v6e: 128 MiB -> 48 MiB).
    """
    try:
        vmem_phys = int(pltpu.get_tpu_info().vmem_capacity_bytes)
    except Exception:  # info unavailable (e.g. interpret mode) -> assume v7x
        vmem_phys = 64 << 20
    budget = min(vmem_phys // 2, 48 << 20)
    brows = budget // (2 * _LANES * bytes_per_elem_all_streams)
    brows = max(512, min((brows // 512) * 512, _MAX_BLOCK_ROWS))
    vmem_limit = int(min(budget + (16 << 20), vmem_phys - (4 << 20)))
    return int(brows), vmem_limit


def _rbf_2d(x2d, c2d, gamma_arr, out_dtype, block_rows):
    """Run the Pallas kernel over a (rows, cols) zero-copy view of the data.

    cols is either 128 (lane-aligned) or the full sub-128 extent of a tiny
    input, so no padding is ever materialized in HBM.
    """
    rows, cols = x2d.shape
    use_centers = c2d is not None

    stream_bytes = x2d.dtype.itemsize + jnp.dtype(out_dtype).itemsize
    if use_centers:
        stream_bytes += c2d.dtype.itemsize

    auto_brows, vmem_limit = _pick_block_rows(stream_bytes)
    brows = auto_brows if block_rows is None else int(block_rows)
    brows = min(rows, max(1, brows))
    if brows < rows:
        brows = max(8, (brows // 8) * 8)  # sublane-aligned row tiles

    grid = (pl.cdiv(rows, brows),)
    tile_spec = pl.BlockSpec((brows, cols), lambda i: (i, 0))

    n_elems = rows * cols
    cost = pl.CostEstimate(
        flops=3 * n_elems,
        transcendentals=n_elems,
        bytes_accessed=stream_bytes * n_elems,
    )

    if use_centers:
        kernel = _rbf_kernel_with_centers
        in_specs = [
            pl.BlockSpec(memory_space=pltpu.SMEM),  # gamma scalar
            tile_spec,                              # x tile (native dtype)
            tile_spec,                              # centers tile
        ]
        args = (gamma_arr, x2d, c2d)
    else:
        kernel = _rbf_kernel_default_centers
        in_specs = [
            pl.BlockSpec(memory_space=pltpu.SMEM),  # gamma scalar
            tile_spec,                              # x tile (native dtype)
        ]
        args = (gamma_arr, x2d)

    return pl.pallas_call(
        kernel,
        out_shape=jax.ShapeDtypeStruct((rows, cols), out_dtype),
        grid=grid,
        in_specs=in_specs,
        out_specs=tile_spec,
        compiler_params=pltpu.CompilerParams(
            dimension_semantics=("parallel",),
            vmem_limit_bytes=vmem_limit,
        ),
        cost_estimate=cost,
    )(*args)


# ---------------------------------------------------------------------------
# Public wrapper (matches GaussianRBF.forward)
# ---------------------------------------------------------------------------
def gaussian_rbf(x, gamma, centers=None, block_rows=None):
    """Pallas implementation of GaussianRBF.forward.

    x:       any-shaped array; flattened internally (matches torch .flatten()).
    gamma:   scalar (or shape-(1,)) learnable parameter.
    centers: optional array broadcast-compatible with the flattened x
             (materialized to (N,) if smaller); defaults to ones, handled
             in-kernel without an extra HBM stream.
    Returns: (N,) array, dtype = promote(x.dtype, centers.dtype, float32),
             N = x.size.
    """
    x_flat = jnp.ravel(x)  # native dtype: no wrapper-side conversion pass
    n = x_flat.shape[0]
    gamma_arr = jnp.asarray(gamma, dtype=jnp.float32).reshape((1,))

    if centers is not None:
        c_flat = jnp.ravel(jnp.broadcast_to(jnp.asarray(centers), x_flat.shape))
        out_dtype = jnp.result_type(x_flat.dtype, c_flat.dtype, jnp.float32)
    else:
        c_flat = None
        out_dtype = jnp.result_type(x_flat.dtype, jnp.float32)

    n_main = (n // _LANES) * _LANES

    if n_main == n:
        # Lane-aligned: zero-copy reshape, no pad, no slice.
        x2d = x_flat.reshape(-1, _LANES)
        c2d = c_flat.reshape(-1, _LANES) if c_flat is not None else None
        return _rbf_2d(x2d, c2d, gamma_arr, out_dtype, block_rows).reshape(-1)

    if n_main == 0:
        # Tiny (<128 elements): single full-extent (1, n) block, still no pad.
        x2d = x_flat.reshape(1, n)
        c2d = c_flat.reshape(1, n) if c_flat is not None else None
        return _rbf_2d(x2d, c2d, gamma_arr, out_dtype, block_rows).reshape(-1)

    # Misaligned: kernel on the 128-aligned prefix, plain jnp for the <128
    # element ragged tail (negligible), then join.  Avoids the old full-array
    # jnp.pad on the input and out[:n] slice on the output.
    x2d = x_flat[:n_main].reshape(-1, _LANES)
    c2d = c_flat[:n_main].reshape(-1, _LANES) if c_flat is not None else None
    y_main = _rbf_2d(x2d, c2d, gamma_arr, out_dtype, block_rows).reshape(-1)

    x_tail = x_flat[n_main:].astype(jnp.float32)
    if c_flat is not None:
        d = x_tail - c_flat[n_main:].astype(jnp.float32)
    else:
        d = x_tail - 1.0
    y_tail = jnp.exp(-gamma_arr[0] * (d * d)).astype(out_dtype)
    return jnp.concatenate([y_main, y_tail])


# ---------------------------------------------------------------------------
# Self-test
# ---------------------------------------------------------------------------
if __name__ == "__main__":
    key = jax.random.PRNGKey(0)
    k0, k1, k2, k3 = jax.random.split(key, 4)

    ok = True

    # --- Test 1: default centers (ones), lane-aligned N (zero-copy path).
    x1 = jax.random.normal(k0, (2, 4, 16, 16), dtype=jnp.float32)  # N = 2048
    gamma1 = jnp.array(1.0, dtype=jnp.float32)  # matches Parameter([1.0]) init
    y1 = jax.block_until_ready(gaussian_rbf(x1, gamma1))
    x1f = jnp.ravel(x1)
    y1_ref = jnp.exp(-gamma1 * jnp.abs(x1f - jnp.ones_like(x1f)) ** 2)
    ok &= y1.shape == (x1.size,) and y1.dtype == jnp.float32
    ok &= bool(jnp.allclose(y1, y1_ref, atol=1e-6, rtol=1e-6))

    # --- Test 2: explicit centers, non-lane-aligned N (prefix + tail path).
    x2 = jax.random.normal(k1, (3, 7, 11), dtype=jnp.float32)      # N = 231
    c2 = jax.random.normal(k2, (3 * 7 * 11,), dtype=jnp.float32)
    gamma2 = jnp.array(0.5, dtype=jnp.float32)
    y2 = jax.block_until_ready(gaussian_rbf(x2, gamma2, centers=c2))
    x2f = jnp.ravel(x2)
    y2_ref = jnp.exp(-gamma2 * jnp.abs(x2f - c2) ** 2)
    ok &= y2.shape == (x2.size,)
    ok &= bool(jnp.allclose(y2, y2_ref, atol=1e-6, rtol=1e-6))

    # --- Test 3: multi-block grid path (small block_rows override).
    y3 = jax.block_until_ready(gaussian_rbf(x1, gamma1, block_rows=8))
    ok &= bool(jnp.allclose(y3, y1_ref, atol=1e-6, rtol=1e-6))

    # --- Test 4: bf16 input, native-dtype DMA + in-register up-cast,
    #             output promoted to float32 (torch promotion with f32 gamma).
    x4 = jax.random.normal(k3, (4, 8, 128), dtype=jnp.float32).astype(jnp.bfloat16)
    y4 = jax.block_until_ready(gaussian_rbf(x4, gamma1))
    x4f = jnp.ravel(x4).astype(jnp.float32)
    y4_ref = jnp.exp(-gamma1 * jnp.abs(x4f - 1.0) ** 2)
    ok &= y4.shape == (x4.size,) and y4.dtype == jnp.float32
    ok &= bool(jnp.allclose(y4, y4_ref, atol=2e-2, rtol=2e-2))

    # TODO(synk): return_numpy / torch.nn.Parameter autograd plumbing from the
    # original module has no Pallas-side equivalent (host-side concerns only).

    assert ok
    print("KERNEL_OK")
</pallas_src>

<mosaic_0001>
module attributes {stable_mosaic.version = 11 : i64} {
  func.func @_rbf_kernel_default_centers(%arg0: i32, %arg1: memref<1xf32, #tpu.memory_space<smem>>, %arg2: memref<16x128xf32, #tpu.memory_space<vmem>>, %arg3: memref<16x128xf32, #tpu.memory_space<vmem>>) attributes {dimension_semantics = [#tpu.dimension_semantics<parallel>], iteration_bounds = array<i64: 1>, scalar_prefetch = 0 : i64, scratch_operands = 0 : i64, tpu.core_type = #tpu.core_type<tc>, window_params = [{transform_indices = @transform_0, window_bounds = array<i64: 1>}, {transform_indices = @transform_1, window_bounds = array<i64: 16, 128>}, {transform_indices = @transform_2, window_bounds = array<i64: 16, 128>}]} {
    %c0 = arith.constant 0 : index
    %0 = memref.load %arg1[%c0] : memref<1xf32, #tpu.memory_space<smem>>
    %c0_0 = arith.constant 0 : index
    %c0_1 = arith.constant 0 : index
    %1 = vector.load %arg2[%c0_0, %c0_1] : memref<16x128xf32, #tpu.memory_space<vmem>>, vector<16x128xf32>
    %cst = arith.constant 1.000000e+00 : f32
    %2 = vector.broadcast %cst : f32 to vector<16x128xf32>
    %3 = arith.subf %1, %2 : vector<16x128xf32>
    %cst_2 = arith.constant 0.000000e+00 : f32
    %4 = arith.subf %cst_2, %0 : f32
    %5 = arith.mulf %3, %3 : vector<16x128xf32>
    %6 = vector.broadcast %4 : f32 to vector<16x128xf32>
    %7 = arith.mulf %6, %5 : vector<16x128xf32>
    %8 = math.exp %7 : vector<16x128xf32>
    %c0_3 = arith.constant 0 : index
    %c0_4 = arith.constant 0 : index
    %9 = vector.load %arg3[%c0_3, %c0_4] : memref<16x128xf32, #tpu.memory_space<vmem>>, vector<16x128xf32>
    tpu.vector_store %arg3[%c0_3, %c0_4], %8 {strides = array<i32>} : memref<16x128xf32, #tpu.memory_space<vmem>>, vector<16x128xf32>,
    return
  }
  func.func @transform_0(%arg0: i32) -> i32 {
    %c0_i32 = arith.constant 0 : i32
    %c0_i32_0 = arith.constant 0 : i32
    return %c0_i32 : i32
  }
  func.func @transform_1(%arg0: i32) -> (i32, i32) {
    %c0_i32 = arith.constant 0 : i32
    %c0_i32_0 = arith.constant 0 : i32
    return %arg0, %c0_i32 : i32, i32
  }
  func.func @transform_2(%arg0: i32) -> (i32, i32) {
    %c0_i32 = arith.constant 0 : i32
    %c0_i32_0 = arith.constant 0 : i32
    return %arg0, %c0_i32 : i32, i32
  }
}

</mosaic_0001>

<bundles_post_ra>
// kernel: tpu_custom_call.1
= control target key start
LH: loop header
LB: loop body
LE: loop exit
PB: predicated region body
PF: predicated region fallthrough
CT: control target
= control target key end

     0   :  { %8 = vsyncpa [#allocation4], 0  ;;  %s171_s0 = inlined_call_operand.<no memory space> [shape: f32[1], index: 0, kind: input, shape index: {}]   ;;  %s172_s1 = inlined_call_operand.hbm [shape: f32[16,128], index: 1, kind: input, shape index: {}]   ;;  %s173_s2 = inlined_call_operand.hbm [shape: f32[16,128], index: 2, kind: output, shape index: {}]  }
   0x1   :  { %9 = vsyncpa [#allocation5], 0  ;;  %s119_s9 = smov [#allocation3]   ;;  %s71_s13 = scalar_lea.hbm %s172_s1, 256 }
   0x2   :  { %s17_s10 = sshll.u32 %s119_s9, 4  ;;  %p72_p0 = scmp.ne.s32.totalorder %s172_s1, %s71_s13  ;;  %s18_s10 = int_to_ptr.vmem [resolvable:$true] %s17_s10 }
   0x3   :  { %p75_p1 = scmp.lt.u32.totalorder %s71_s13, %s172_s1 }
   0x5   :  { %p77_p2 = pnand %p75_p1, %p72_p0 }
   0x7   :  { %80 = shalt.err (!%p77_p2)
}
   0x8   :  { %s81_s18 = scalar_lea.vmem %s18_s10, 256  ;;  %p86_p4 = scmp.lt.s32.totalorder %s18_s10, %s18_s10 }
   0x9   :  { %p82_p3 = scmp.ne.s32.totalorder %s18_s10, %s81_s18  ;;  %p87_p5 = scmp.lt.s32.totalorder %s81_s18, %s81_s18 }
   0xb   :  { %p88_p6 = por %p87_p5, %p86_p4 }
   0xd   :  { %p89_p7 = pnand %p88_p6, %p82_p3 }
   0xf   :  { %92 = shalt.err (!%p89_p7)
}
  0x10   :  { %s120_s19 = smov 128   ;;  %s121_s20 = smov 8  }
  0x11   :  { %23 = dma.hbm_to_vmem [thread:$0]  %s172_s1, 256, %s18_s10, [#allocation4], %s120_s19, %s120_s19, %s121_s20  }
  0x12   :  { %115 = dma.done.wait [#allocation4], 256  }
  0x13   :  { %116 = vsyncadd [#allocation4], 4294967040  ;;  %s32_s25 = ssub.f32 0.0, %s171_s0  ;;  %v28_v0 = vld [vmem:[#allocation3] sm:$0xff]  ;;  %v29_v1 = vld [vmem:[#allocation3 + $0x8] sm:$0xff]  ;;  %s122_s1 = smov [#allocation6]  }
  0x14   :  { %v61_v2 = vadd.f32 -1.0, %v28_v0  ;;  %v62_v3 = vadd.f32 -1.0, %v29_v1  ;;  %s49_s26 = sshll.u32 %s122_s1, 4  ;;  %s50_s26 = int_to_ptr.vmem [resolvable:$true] %s49_s26 }
  0x15   :  { %v35_v4 = vstv %s32_s25  ;;  %s93_s0 = scalar_lea.vmem %s50_s26, 256  ;;  %p98_p9 = scmp.lt.s32.totalorder %s50_s26, %s50_s26 }
  0x16   :  { %v33_v5 = vmul.f32 %v61_v2, %v61_v2  ;;  %v34_v6 = vmul.f32 %v62_v3, %v62_v3  ;;  %p94_p8 = scmp.ne.s32.totalorder %s50_s26, %s93_s0  ;;  %p99_p10 = scmp.lt.s32.totalorder %s93_s0, %s93_s0 }
  0x18   :  { %v36_v7 = vmul.f32 %v35_v4, %v33_v5  ;;  %v37_v8 = vmul.f32 %v35_v4, %v34_v6  ;;  %p100_p11 = por %p99_p10, %p98_p9 }
  0x1a   :  { %v38_v9 = vmul.f32 1.442695, %v36_v7  ;;  %v40_v10 = vmul.f32 1.442695, %v37_v8  ;;  %p101_p12 = pnand %p100_p11, %p94_p8 }
  0x1c   :  { %67 = vpow2.f32 %v38_v9 }
  0x1d   :  { %69 = vpow2.f32 %v40_v10 }
  0x26   :  { %v68_v11 = vpop.eup %67 }
  0x27   :  { %v70_v12 = vpop.eup %69  ;;  %42 = vst [vmem:[#allocation6] sm:$0xff] %v68_v11 }
  0x28   :  { %43 = vst [vmem:[#allocation6 + $0x8] sm:$0xff] %v70_v12 }
  0x29   :  { %104 = shalt.err (!%p101_p12)
}
  0x2a   :  { %s105_s29 = scalar_lea.hbm %s173_s2, 256 }
  0x2b   :  { %p106_p13 = scmp.ne.s32.totalorder %s173_s2, %s105_s29  ;;  %p109_p0 = scmp.lt.u32.totalorder %s105_s29, %s173_s2 }
  0x2d   :  { %p111_p1 = pnand %p109_p0, %p106_p13 }
  0x2f   :  { %114 = shalt.err (!%p111_p1)
}
  0x30   :  { %55 = dma.vmem_to_hbm [thread:$0]  %s50_s26, 256, %s173_s2, [#allocation5], %s120_s19, %s120_s19, %s121_s20  }
  0x31   :  { %117 = dma.done.wait [#allocation5], 256  }
  0x32   :  { %118 = vsyncadd [#allocation5], 4294967040 }
  0x33   :  { %59 = vsyncpa [#allocation4], 1 }
  0x34   :  { %60 = vsyncpa [#allocation5], 1 }

</bundles_post_ra>
